<compile_context>
chip_gen: v6e
topology: v6e:2x2x1
jax: 0.10.0
libtpu: 0.0.40
codegen_flags: <defaults>
</compile_context>

<pallas_src>
import jax
import jax.numpy as jnp
from jax.experimental import pallas as pl
from jax.experimental.pallas import tpu as pltpu

_LANE = 128         # TPU lane width (last dim)
_SUBLANE_BF16 = 16  # bf16 sublane packing (second-to-last dim)
_NEG_FILL = -1e30   # fill for padded class columns of b3 (keeps log_softmax exact)
_TARGET_ROWS = 256  # target G*Np rows per step (v6e/v7x MXU is 2x256^2)


def _round_up(x, m):
    return (x + m - 1) // m * m


def _cdiv(a, b):
    return (a + b - 1) // b


def gnn_kernel(x_ref, adj_ref, w1_ref, b1_ref, w2_ref, b2_ref, w3_ref, b3_ref,
               logp_ref, drop2_ref):
    """G graphs per grid step.  x/adj/weights are bf16, biases f32; all dots accumulate
    in f32 on the MXU, bias adds and log_softmax run in f32.  All lane dims of the two
    outputs are 128-multiples -> unmasked stores."""
    G, Np, F = x_ref.shape
    H1p = w1_ref.shape[1]
    H2p = w2_ref.shape[1]
    Cp = w3_ref.shape[1]

    adj = adj_ref[...]                                   # (G, Np, Np) bf16
    x2d = x_ref[...].reshape(G * Np, F)                  # (G*Np, F)  bf16

    # fc1 = x @ W1 + b1 ; output1 = relu(adj @ fc1) ; dropout (eval) = identity
    fc1 = jnp.dot(x2d, w1_ref[...],
                  preferred_element_type=jnp.float32) + b1_ref[...]
    fc1 = fc1.reshape(G, Np, H1p).astype(jnp.bfloat16)
    out1 = jnp.maximum(
        jnp.einsum('gij,gjk->gik', adj, fc1,
                   preferred_element_type=jnp.float32), 0.0)

    # fc2 = drop1 @ W2 + b2 ; output2 = relu(adj @ fc2) ; dropout (eval) = identity
    fc2 = jnp.dot(out1.reshape(G * Np, H1p).astype(jnp.bfloat16), w2_ref[...],
                  preferred_element_type=jnp.float32) + b2_ref[...]
    fc2 = fc2.reshape(G, Np, H2p).astype(jnp.bfloat16)
    out2 = jnp.maximum(
        jnp.einsum('gij,gjk->gik', adj, fc2,
                   preferred_element_type=jnp.float32), 0.0)
    drop2_ref[...] = out2.astype(drop2_ref.dtype)

    # fc3 = drop2 @ W3 + b3, then log_softmax over classes.  Padded class columns get
    # fc3 = 0 (zero W3 columns) + b3_pad = -1e30: they never win the max and contribute
    # exp(...) = 0 to the sum, so the lse over the real classes is exact.
    fc3 = jnp.dot(out2.reshape(G * Np, H2p).astype(jnp.bfloat16), w3_ref[...],
                  preferred_element_type=jnp.float32) + b3_ref[...]
    m = jnp.max(fc3, axis=-1, keepdims=True)
    shifted = fc3 - m
    lse = jnp.log(jnp.sum(jnp.exp(shifted), axis=-1, keepdims=True))
    logp_ref[...] = (shifted - lse).reshape(G, Np, Cp).astype(logp_ref.dtype)


def _pad2d(a, rows, cols, fill=0.0):
    return jnp.pad(a, ((0, rows - a.shape[0]), (0, cols - a.shape[1])),
                   constant_values=fill)


def pad_params(params):
    """Weights -> bf16, zero-padded to lane-dense widths (feature dim F untouched);
    biases stay f32; padded class columns of b3 are filled with -1e30."""
    w1, b1, w2, b2, w3, b3 = params
    F, H1 = w1.shape
    H2 = w2.shape[1]
    C = w3.shape[1]
    H1p, H2p, Cp = (_round_up(d, _LANE) for d in (H1, H2, C))
    return (_pad2d(w1, F, H1p).astype(jnp.bfloat16),
            _pad2d(b1, 1, H1p).astype(jnp.float32),
            _pad2d(w2, H1p, H2p).astype(jnp.bfloat16),
            _pad2d(b2, 1, H2p).astype(jnp.float32),
            _pad2d(w3, H2p, Cp).astype(jnp.bfloat16),
            _pad2d(b3, 1, Cp, fill=_NEG_FILL).astype(jnp.float32))


def _choose_graphs_per_step(B, Np):
    """Pick G: ~_TARGET_ROWS rows of packed M per step, but keep >=2 grid steps
    (megacore on v7x) whenever there are >=2 graphs."""
    G = max(1, _TARGET_ROWS // Np)
    if B >= 2:
        G = min(G, _cdiv(B, 2))
    return max(1, min(G, B))


def gnn_forward_batched(x_in, adj, params):
    """Batched GNN forward.

    x_in: (B, N, n_feat), adj: (B, N, N) dense.  Weights (in, out), biases (1, out).
    Returns (log_softmax(fc3), drop2) with shapes (B, N, n_class), (B, N, n_hidden_2).
    """
    w1, b1, w2, b2, w3, b3 = params
    B, N, F = x_in.shape
    H1, H2, C = w1.shape[1], w2.shape[1], w3.shape[1]

    Np = _round_up(N, _SUBLANE_BF16)                 # bf16 sublane packing = 16
    H1p, H2p, Cp = (_round_up(d, _LANE) for d in (H1, H2, C))

    G = _choose_graphs_per_step(B, Np)
    Bp = _round_up(B, G)
    steps = Bp // G

    xp = jnp.pad(x_in, ((0, Bp - B), (0, Np - N), (0, 0))).astype(jnp.bfloat16)
    adjp = jnp.pad(adj, ((0, Bp - B), (0, Np - N), (0, Np - N))).astype(jnp.bfloat16)
    w1p, b1p, w2p, b2p, w3p, b3p = pad_params(params)

    per_step = lambda b: (b, 0, 0)   # G graphs per grid step
    resident = lambda b: (0, 0)      # weights: same block every step -> stay in VMEM

    in_specs = [
        pl.BlockSpec((G, Np, F), per_step),          # x   (bf16, F unpadded)
        pl.BlockSpec((G, Np, Np), per_step),         # adj (bf16)
        pl.BlockSpec((F, H1p), resident),            # W1  (bf16)
        pl.BlockSpec((1, H1p), resident),            # b1  (f32)
        pl.BlockSpec((H1p, H2p), resident),          # W2  (bf16)
        pl.BlockSpec((1, H2p), resident),            # b2  (f32)
        pl.BlockSpec((H2p, Cp), resident),           # W3  (bf16)
        pl.BlockSpec((1, Cp), resident),             # b3  (f32, -1e30 pad)
    ]
    out_specs = (
        pl.BlockSpec((G, Np, Cp), per_step),         # log-probs (lane-dense, f32)
        pl.BlockSpec((G, Np, H2p), per_step),        # drop2     (lane-dense, f32)
    )
    out_shapes = (
        jax.ShapeDtypeStruct((Bp, Np, Cp), jnp.float32),
        jax.ShapeDtypeStruct((Bp, Np, H2p), jnp.float32),
    )

    # VMEM budget from the actual block footprint (double-buffered streamed blocks +
    # resident weights + f32 intermediates), with headroom; capped at 48 MiB (v7x-safe).
    bf16, f32 = 2, 4
    block_in = G * Np * F * bf16 + G * Np * Np * bf16
    block_out = G * Np * Cp * f32 + G * Np * H2p * f32
    weights = ((F * H1p + H1p * H2p + H2p * Cp) * bf16
               + (H1p + H2p + Cp) * f32)
    intermediates = G * Np * (2 * H1p + 2 * H2p + Cp) * f32
    footprint = 2 * (block_in + block_out) + 2 * weights + intermediates
    vmem_limit = int(min(max(footprint * 3 // 2 + (4 << 20), 16 << 20), 48 << 20))

    flops = 2 * Bp * (Np * F * H1p + Np * Np * H1p + Np * H1p * H2p
                      + Np * Np * H2p + Np * H2p * Cp)
    bytes_accessed = (bf16 * (Bp * Np * F + Bp * Np * Np
                              + F * H1p + H1p * H2p + H2p * Cp)
                      + f32 * (H1p + H2p + Cp + Bp * Np * Cp + Bp * Np * H2p))
    cost = pl.CostEstimate(flops=int(flops),
                           transcendentals=int(Bp * Np * Cp),  # exp in log_softmax
                           bytes_accessed=int(bytes_accessed))

    logp_p, drop2_p = pl.pallas_call(
        gnn_kernel,
        grid=(steps,),
        in_specs=in_specs,
        out_specs=out_specs,
        out_shape=out_shapes,
        compiler_params=pltpu.CompilerParams(
            dimension_semantics=("parallel",),  # v7x: grid steps split across the 2 TCs
            vmem_limit_bytes=vmem_limit,
        ),
        cost_estimate=cost,
    )(xp, adjp, w1p, b1p, w2p, b2p, w3p, b3p)

    return logp_p[:B, :N, :C], drop2_p[:B, :N, :H2]


def gnn_forward(x_in, adj, params):
    """Single-graph forward matching the PyTorch module's signature/semantics."""
    logp, drop2 = gnn_forward_batched(x_in[None], adj[None], params)
    return logp[0], drop2[0]


def init_params(key, n_feat, n_hidden_1, n_hidden_2, n_class):
    """Deterministic synthetic params; Linear weights stored as (in, out)."""
    ks = jax.random.split(key, 6)

    def lin(kw, kb, fan_in, fan_out):
        bound = 1.0 / jnp.sqrt(fan_in)
        w = jax.random.uniform(kw, (fan_in, fan_out), jnp.float32, -bound, bound)
        b = jax.random.uniform(kb, (1, fan_out), jnp.float32, -bound, bound)
        return w, b

    w1, b1 = lin(ks[0], ks[1], n_feat, n_hidden_1)
    w2, b2 = lin(ks[2], ks[3], n_hidden_1, n_hidden_2)
    w3, b3 = lin(ks[4], ks[5], n_hidden_2, n_class)
    return (w1, b1, w2, b2, w3, b3)


if __name__ == "__main__":
    # Small graphs: B graphs of N nodes, n_feat input features each.
    B, N, n_feat, n_hidden_1, n_hidden_2, n_class = 4, 8, 16, 32, 32, 8

    key = jax.random.PRNGKey(0)
    kx, kadj, kp = jax.random.split(key, 3)

    x_in = jax.random.normal(kx, (B, N, n_feat), jnp.float32)

    # Symmetric normalized adjacency with self loops (dense), per graph.
    a = (jax.random.uniform(kadj, (B, N, N)) < 0.3).astype(jnp.float32)
    a = jnp.maximum(a, jnp.swapaxes(a, -1, -2)) + jnp.eye(N, dtype=jnp.float32)
    deg = jnp.sum(a, axis=-1, keepdims=True)
    adj = a / deg

    params = init_params(kp, n_feat, n_hidden_1, n_hidden_2, n_class)

    # Batched kernel (G graphs per grid step).
    logp, drop2 = gnn_forward_batched(x_in, adj, params)
    jax.block_until_ready((logp, drop2))

    # Single-graph path (original module semantics: one graph per forward).
    logp0, drop20 = gnn_forward(x_in[0], adj[0], params)
    jax.block_until_ready((logp0, drop20))

    # Pure-JAX f32 reference (matches the PyTorch module in eval mode).  The kernel uses
    # bf16 matmul operands with f32 accumulation, so use bf16-appropriate tolerances.
    w1, b1, w2, b2, w3, b3 = params

    def ref(x, A):
        fc1 = x @ w1 + b1
        o1 = jnp.maximum(A @ fc1, 0.0)
        fc2 = o1 @ w2 + b2
        o2 = jnp.maximum(A @ fc2, 0.0)
        fc3 = o2 @ w3 + b3
        return jax.nn.log_softmax(fc3, axis=1), o2

    ATOL = RTOL = 3e-2
    ok = True
    for g in range(B):
        r_logp, r_o2 = ref(x_in[g], adj[g])
        ok &= bool(jnp.allclose(logp[g], r_logp, atol=ATOL, rtol=RTOL))
        ok &= bool(jnp.allclose(drop2[g], r_o2, atol=ATOL, rtol=RTOL))
    r_logp0, r_o20 = ref(x_in[0], adj[0])
    ok &= bool(jnp.allclose(logp0, r_logp0, atol=ATOL, rtol=RTOL))
    ok &= bool(jnp.allclose(drop20, r_o20, atol=ATOL, rtol=RTOL))
    assert ok, "mismatch vs pure-JAX reference"

    print("KERNEL_OK")
</pallas_src>

<mosaic_0001>
module attributes {stable_mosaic.version = 11 : i64} {
  func.func @gnn_kernel(%arg0: i32, %arg1: memref<2x16x16xbf16, #tpu.memory_space<vmem>>, %arg2: memref<2x16x16xbf16, #tpu.memory_space<vmem>>, %arg3: memref<16x128xbf16, #tpu.memory_space<vmem>>, %arg4: memref<1x128xf32, #tpu.memory_space<vmem>>, %arg5: memref<128x128xbf16, #tpu.memory_space<vmem>>, %arg6: memref<1x128xf32, #tpu.memory_space<vmem>>, %arg7: memref<128x128xbf16, #tpu.memory_space<vmem>>, %arg8: memref<1x128xf32, #tpu.memory_space<vmem>>, %arg9: memref<2x16x128xf32, #tpu.memory_space<vmem>>, %arg10: memref<2x16x128xf32, #tpu.memory_space<vmem>>) attributes {dimension_semantics = [#tpu.dimension_semantics<parallel>], iteration_bounds = array<i64: 2>, scalar_prefetch = 0 : i64, scratch_operands = 0 : i64, tpu.core_type = #tpu.core_type<tc>, window_params = [{transform_indices = @transform_0, window_bounds = array<i64: 2, 16, 16>}, {transform_indices = @transform_1, window_bounds = array<i64: 2, 16, 16>}, {pipeline_mode = #tpu.pipeline_mode<synchronous>, transform_indices = @transform_2, window_bounds = array<i64: 16, 128>}, {pipeline_mode = #tpu.pipeline_mode<synchronous>, transform_indices = @transform_3, window_bounds = array<i64: 1, 128>}, {pipeline_mode = #tpu.pipeline_mode<synchronous>, transform_indices = @transform_4, window_bounds = array<i64: 128, 128>}, {pipeline_mode = #tpu.pipeline_mode<synchronous>, transform_indices = @transform_5, window_bounds = array<i64: 1, 128>}, {pipeline_mode = #tpu.pipeline_mode<synchronous>, transform_indices = @transform_6, window_bounds = array<i64: 128, 128>}, {pipeline_mode = #tpu.pipeline_mode<synchronous>, transform_indices = @transform_7, window_bounds = array<i64: 1, 128>}, {transform_indices = @transform_8, window_bounds = array<i64: 2, 16, 128>}, {transform_indices = @transform_9, window_bounds = array<i64: 2, 16, 128>}]} {
    %c0 = arith.constant 0 : index
    %c0_0 = arith.constant 0 : index
    %c0_1 = arith.constant 0 : index
    %0 = vector.load %arg2[%c0, %c0_0, %c0_1] : memref<2x16x16xbf16, #tpu.memory_space<vmem>>, vector<2x16x16xbf16>
    %c0_2 = arith.constant 0 : index
    %c0_3 = arith.constant 0 : index
    %c0_4 = arith.constant 0 : index
    %1 = vector.load %arg1[%c0_2, %c0_3, %c0_4] : memref<2x16x16xbf16, #tpu.memory_space<vmem>>, vector<2x16x16xbf16>
    %2 = vector.shape_cast %1 : vector<2x16x16xbf16> to vector<32x16xbf16>
    %c0_5 = arith.constant 0 : index
    %c0_6 = arith.constant 0 : index
    %3 = vector.load %arg3[%c0_5, %c0_6] : memref<16x128xbf16, #tpu.memory_space<vmem>>, vector<16x128xbf16>
    %cst = arith.constant dense<0.000000e+00> : vector<32x128xf32>
    %4 = tpu.matmul %2, %3, %cst {dimension_numbers = #tpu.dot_dimension_numbers<[1], [0], [0], [1], [0, 0, 1, 1], [], []>} : vector<32x16xbf16>, vector<16x128xbf16>, vector<32x128xf32> -> vector<32x128xf32>
    %c0_7 = arith.constant 0 : index
    %c0_8 = arith.constant 0 : index
    %5 = vector.load %arg4[%c0_7, %c0_8] : memref<1x128xf32, #tpu.memory_space<vmem>>, vector<1x128xf32>
    %6 = vector.broadcast %5 : vector<1x128xf32> to vector<32x128xf32>
    %7 = arith.addf %4, %6 : vector<32x128xf32>
    %8 = vector.shape_cast %7 : vector<32x128xf32> to vector<2x16x128xf32>
    %9 = arith.truncf %8 : vector<2x16x128xf32> to vector<2x16x128xbf16>
    "tpu.trace_start"() <{level = 10 : i32, message = "gij,gjk->gik"}> : () -> ()
    %cst_9 = arith.constant dense<0.000000e+00> : vector<2x16x128xf32>
    %10 = tpu.matmul %0, %9, %cst_9 {dimension_numbers = #tpu.dot_dimension_numbers<[2], [1], [1], [2], [0, 0, 0, 1, 1, 2], [0], [0]>} : vector<2x16x16xbf16>, vector<2x16x128xbf16>, vector<2x16x128xf32> -> vector<2x16x128xf32>
    "tpu.trace_stop"() : () -> ()
    %cst_10 = arith.constant 0.000000e+00 : f32
    %11 = vector.broadcast %cst_10 : f32 to vector<2x16x128xf32>
    %12 = arith.maximumf %10, %11 : vector<2x16x128xf32>
    %13 = vector.shape_cast %12 : vector<2x16x128xf32> to vector<32x128xf32>
    %14 = arith.truncf %13 : vector<32x128xf32> to vector<32x128xbf16>
    %c0_11 = arith.constant 0 : index
    %c0_12 = arith.constant 0 : index
    %15 = vector.load %arg5[%c0_11, %c0_12] : memref<128x128xbf16, #tpu.memory_space<vmem>>, vector<128x128xbf16>
    %cst_13 = arith.constant dense<0.000000e+00> : vector<32x128xf32>
    %16 = tpu.matmul %14, %15, %cst_13 {dimension_numbers = #tpu.dot_dimension_numbers<[1], [0], [0], [1], [0, 0, 1, 1], [], []>} : vector<32x128xbf16>, vector<128x128xbf16>, vector<32x128xf32> -> vector<32x128xf32>
    %c0_14 = arith.constant 0 : index
    %c0_15 = arith.constant 0 : index
    %17 = vector.load %arg6[%c0_14, %c0_15] : memref<1x128xf32, #tpu.memory_space<vmem>>, vector<1x128xf32>
    %18 = vector.broadcast %17 : vector<1x128xf32> to vector<32x128xf32>
    %19 = arith.addf %16, %18 : vector<32x128xf32>
    %20 = vector.shape_cast %19 : vector<32x128xf32> to vector<2x16x128xf32>
    %21 = arith.truncf %20 : vector<2x16x128xf32> to vector<2x16x128xbf16>
    "tpu.trace_start"() <{level = 10 : i32, message = "gij,gjk->gik"}> : () -> ()
    %cst_16 = arith.constant dense<0.000000e+00> : vector<2x16x128xf32>
    %22 = tpu.matmul %0, %21, %cst_16 {dimension_numbers = #tpu.dot_dimension_numbers<[2], [1], [1], [2], [0, 0, 0, 1, 1, 2], [0], [0]>} : vector<2x16x16xbf16>, vector<2x16x128xbf16>, vector<2x16x128xf32> -> vector<2x16x128xf32>
    "tpu.trace_stop"() : () -> ()
    %cst_17 = arith.constant 0.000000e+00 : f32
    %23 = vector.broadcast %cst_17 : f32 to vector<2x16x128xf32>
    %24 = arith.maximumf %22, %23 : vector<2x16x128xf32>
    %c0_18 = arith.constant 0 : index
    %c0_19 = arith.constant 0 : index
    %c0_20 = arith.constant 0 : index
    %25 = vector.load %arg10[%c0_18, %c0_19, %c0_20] : memref<2x16x128xf32, #tpu.memory_space<vmem>>, vector<2x16x128xf32>
    tpu.vector_store %arg10[%c0_18, %c0_19, %c0_20], %24 {strides = array<i32>} : memref<2x16x128xf32, #tpu.memory_space<vmem>>, vector<2x16x128xf32>,
    %26 = vector.shape_cast %24 : vector<2x16x128xf32> to vector<32x128xf32>
    %27 = arith.truncf %26 : vector<32x128xf32> to vector<32x128xbf16>
    %c0_21 = arith.constant 0 : index
    %c0_22 = arith.constant 0 : index
    %28 = vector.load %arg7[%c0_21, %c0_22] : memref<128x128xbf16, #tpu.memory_space<vmem>>, vector<128x128xbf16>
    %cst_23 = arith.constant dense<0.000000e+00> : vector<32x128xf32>
    %29 = tpu.matmul %27, %28, %cst_23 {dimension_numbers = #tpu.dot_dimension_numbers<[1], [0], [0], [1], [0, 0, 1, 1], [], []>} : vector<32x128xbf16>, vector<128x128xbf16>, vector<32x128xf32> -> vector<32x128xf32>
    %c0_24 = arith.constant 0 : index
    %c0_25 = arith.constant 0 : index
    %30 = vector.load %arg8[%c0_24, %c0_25] : memref<1x128xf32, #tpu.memory_space<vmem>>, vector<1x128xf32>
    %31 = vector.broadcast %30 : vector<1x128xf32> to vector<32x128xf32>
    %32 = arith.addf %29, %31 : vector<32x128xf32>
    %cst_26 = arith.constant dense<0xFF800000> : vector<32xf32>
    %33 = vector.multi_reduction <maximumf>, %32, %cst_26 [1] : vector<32x128xf32> to vector<32xf32>
    %34 = vector.shape_cast %33 : vector<32xf32> to vector<32x1xf32>
    %35 = vector.broadcast %34 : vector<32x1xf32> to vector<32x128xf32>
    %36 = arith.subf %32, %35 : vector<32x128xf32>
    %37 = math.exp %36 : vector<32x128xf32>
    %cst_27 = arith.constant dense<0.000000e+00> : vector<32xf32>
    %38 = vector.multi_reduction <add>, %37, %cst_27 [1] : vector<32x128xf32> to vector<32xf32>
    %39 = vector.shape_cast %38 : vector<32xf32> to vector<32x1xf32>
    %40 = math.log %39 : vector<32x1xf32>
    %41 = vector.broadcast %40 : vector<32x1xf32> to vector<32x128xf32>
    %42 = arith.subf %36, %41 : vector<32x128xf32>
    %43 = vector.shape_cast %42 : vector<32x128xf32> to vector<2x16x128xf32>
    %c0_28 = arith.constant 0 : index
    %c0_29 = arith.constant 0 : index
    %c0_30 = arith.constant 0 : index
    %44 = vector.load %arg9[%c0_28, %c0_29, %c0_30] : memref<2x16x128xf32, #tpu.memory_space<vmem>>, vector<2x16x128xf32>
    tpu.vector_store %arg9[%c0_28, %c0_29, %c0_30], %43 {strides = array<i32>} : memref<2x16x128xf32, #tpu.memory_space<vmem>>, vector<2x16x128xf32>,
    return
  }
  func.func @transform_0(%arg0: i32) -> (i32, i32, i32) {
    %c0_i32 = arith.constant 0 : i32
    %c0_i32_0 = arith.constant 0 : i32
    %c0_i32_1 = arith.constant 0 : i32
    return %arg0, %c0_i32, %c0_i32_0 : i32, i32, i32
  }
  func.func @transform_1(%arg0: i32) -> (i32, i32, i32) {
    %c0_i32 = arith.constant 0 : i32
    %c0_i32_0 = arith.constant 0 : i32
    %c0_i32_1 = arith.constant 0 : i32
    return %arg0, %c0_i32, %c0_i32_0 : i32, i32, i32
  }
  func.func @transform_2(%arg0: i32) -> (i32, i32) {
    %c0_i32 = arith.constant 0 : i32
    %c0_i32_0 = arith.constant 0 : i32
    %c0_i32_1 = arith.constant 0 : i32
    return %c0_i32, %c0_i32_0 : i32, i32
  }
  func.func @transform_3(%arg0: i32) -> (i32, i32) {
    %c0_i32 = arith.constant 0 : i32
    %c0_i32_0 = arith.constant 0 : i32
    %c0_i32_1 = arith.constant 0 : i32
    return %c0_i32, %c0_i32_0 : i32, i32
  }
  func.func @transform_4(%arg0: i32) -> (i32, i32) {
    %c0_i32 = arith.constant 0 : i32
    %c0_i32_0 = arith.constant 0 : i32
    %c0_i32_1 = arith.constant 0 : i32
    return %c0_i32, %c0_i32_0 : i32, i32
  }
  func.func @transform_5(%arg0: i32) -> (i32, i32) {
    %c0_i32 = arith.constant 0 : i32
    %c0_i32_0 = arith.constant 0 : i32
    %c0_i32_1 = arith.constant 0 : i32
    return %c0_i32, %c0_i32_0 : i32, i32
  }
  func.func @transform_6(%arg0: i32) -> (i32, i32) {
    %c0_i32 = arith.constant 0 : i32
    %c0_i32_0 = arith.constant 0 : i32
    %c0_i32_1 = arith.constant 0 : i32
    return %c0_i32, %c0_i32_0 : i32, i32
  }
  func.func @transform_7(%arg0: i32) -> (i32, i32) {
    %c0_i32 = arith.constant 0 : i32
    %c0_i32_0 = arith.constant 0 : i32
    %c0_i32_1 = arith.constant 0 : i32
    return %c0_i32, %c0_i32_0 : i32, i32
  }
  func.func @transform_8(%arg0: i32) -> (i32, i32, i32) {
    %c0_i32 = arith.constant 0 : i32
    %c0_i32_0 = arith.constant 0 : i32
    %c0_i32_1 = arith.constant 0 : i32
    return %arg0, %c0_i32, %c0_i32_0 : i32, i32, i32
  }
  func.func @transform_9(%arg0: i32) -> (i32, i32, i32) {
    %c0_i32 = arith.constant 0 : i32
    %c0_i32_0 = arith.constant 0 : i32
    %c0_i32_1 = arith.constant 0 : i32
    return %arg0, %c0_i32, %c0_i32_0 : i32, i32, i32
  }
}

</mosaic_0001>

<bundles_post_ra>
// kernel: tpu_custom_call.1
= control target key start
LH: loop header
LB: loop body
LE: loop exit
PB: predicated region body
PF: predicated region fallthrough
CT: control target
= control target key end

     0   :  { %s2185_s0 = inlined_call_operand.hbm [shape: bf16[4,16,16], index: 0, kind: input, shape index: {}]   ;;  %s2186_s1 = inlined_call_operand.hbm [shape: bf16[4,16,16], index: 1, kind: input, shape index: {}]   ;;  %s2187_s2 = inlined_call_operand.hbm [shape: bf16[16,128], index: 2, kind: input, shape index: {}]   ;;  %s2188_s3 = inlined_call_operand.vmem [shape: f32[1,128], index: 3, kind: input, shape index: {}]   ;;  %s2189_s4 = inlined_call_operand.hbm [shape: bf16[128,128], index: 4, kind: input, shape index: {}]   ;;  %s2190_s5 = inlined_call_operand.vmem [shape: f32[1,128], index: 5, kind: input, shape index: {}]   ;;  %s2191_s6 = inlined_call_operand.hbm [shape: bf16[128,128], index: 6, kind: input, shape index: {}]   ;;  %s2192_s7 = inlined_call_operand.vmem [shape: f32[1,128], index: 7, kind: input, shape index: {}]   ;;  %s2193_s8 = inlined_call_operand.hbm [shape: f32[4,16,128], index: 8, kind: output, shape index: {0}]   ;;  %s2194_s9 = inlined_call_operand.hbm [shape: f32[4,16,128], index: 9, kind: output, shape index: {1}]  }
   0x1   :  { %2206 = sst [smem:[#allocation24_spill]] %s2185_s0 }
   0x2   :  { %2207 = sst [smem:[#allocation25_spill]] %s2187_s2 }
   0x3   :  { %2208 = sst [smem:[#allocation26_spill]] %s2189_s4 }
   0x4   :  { %2209 = sst [smem:[#allocation27_spill]] %s2191_s6 }
   0x5   :  { %15 = vsyncpa [#allocation3], 0 }
   0x6   :  { %17 = vsyncpa [#allocation3 + $0x1], 0 }
   0x7   :  { %18 = vsyncpa [#allocation6], 0 }
   0x8   :  { %20 = vsyncpa [#allocation6 + $0x1], 0 }
   0x9   :  { %21 = vsyncpa [#allocation9], 0 }
   0xa   :  { %22 = vsyncpa [#allocation4], 0 }
   0xb   :  { %24 = vsyncpa [#allocation4 + $0x1], 0 }
   0xc   :  { %25 = vsyncpa [#allocation13], 0 }
   0xd   :  { %27 = vsyncpa [#allocation13 + $0x1], 0  ;;  %s1824_s30 = smov 0   ;;  %s1826_s10 = smov 0  }
   0xe   :  { %s1828_s11 = smov 0   ;;  %s1830_s12 = smov 0  }
   0xf LB: > { %2210 = sst [smem:[#allocation20_spill]] %s1755_s11  ;;  %s1845_s13 = sadd.s32 4294967295, %s1759_s12   ;;  %s1759_s12 = sphi %s1830_s12, %s2235_s12   ;;  %s1755_s11 = sphi %s1828_s11, %s2237_s11   ;;  %s1751_s10 = sphi %s1826_s10, %s2239_s10   ;;  %s1747_s30 = sphi %s1824_s30, %s2238_s30  }
  0x10   : > { %s1218_s14 = sadd.s32 4294967294, %s1759_s12   ;;  %p53_p0 = scmp.ne.s32.totalorder %s1751_s10, %s1747_s30 }
  0x11   : > { %p2195_p1 = scmp.eq.s32.totalorder %s1845_s13, 0  ;;  %p229_p2 = scmp.eq.s32.totalorder %s1845_s13, 1 }
  0x12   : > { %p235_p3 = scmp.eq.s32.totalorder %s1218_s14, 1  ;;  %p1219_p5 = scmp.ge.s32.totalorder %s1759_s12, 1 }
  0x13   : > { %p1854_p4 = por %p2195_p1, %p53_p0  ;;  %p268_p7 = scmp.lt.s32.totalorder %s1759_s12, 3 }
  0x14   : > { %p1859_p6 = por %p235_p3, %p53_p0  ;;  %s1761_s18 = smov [#allocation7]  }
  0x15   : > { %s2211_s15 = scalar_select %p1854_p4, 1, 0 }
  0x16   : > { %s2212_s16 = scalar_select %p1859_p6, 1, 0 }
  0x17   : > { %p1864_p8 = pnand %p1219_p5, %p268_p7  ;;  %s280_s19 = sshll.u32 %s1761_s18, 4  ;;  %s281_s19 = int_to_ptr.vmem [resolvable:$true] %s280_s19 }
  0x18   : > { %2213 = sst [smem:[#allocation21_spill]] %s2212_s16  ;;  %s1762_s21 = smov [#allocation8]  }
  0x19   : > { %p1409_p9 = pneg %p1864_p8  ;;  %s296_s22 = sshll.u32 %s1762_s21, 4  ;;  %s297_s22 = int_to_ptr.vmem [resolvable:$true] %s296_s22 }
  0x1a   : > { %s1763_s23 = smov [#allocation10]   ;;  %s1530_s25 = scalar_lea.vmem %s281_s19, 128 }
  0x1b   : > { %p1873_p11 = pnand %p1409_p9, %p2195_p1  ;;  %s312_s24 = sshll.u32 %s1763_s23, 4  ;;  %s313_s24 = int_to_ptr.vmem [resolvable:$true] %s312_s24 }
  0x1c   : > { %p1531_p13 = scmp.ne.s32.totalorder %s281_s19, %s1530_s25  ;;  %p1538_p5 = scmp.lt.s32.totalorder %s281_s19, %s281_s19 }
  0x1d   : > { %p1521_p12 = pneg %p1873_p11  ;;  %p1539_p7 = scmp.lt.s32.totalorder %s1530_s25, %s1530_s25 }
  0x1f   : > { %p1533_p0 = pnand %p1531_p13, %p1521_p12  ;;  %p1540_p9 = por %p1539_p7, %p1538_p5 }
  0x21   : > { %p1534_p3 = pneg %p1533_p0 }
  0x23   : > { %p1541_p10 = pnand %p1540_p9, %p1534_p3 }
  0x25   : > { %1544 = shalt.err (!%p1541_p10)
}
  0x26   : > { %s2196_s26 = smov 64   ;;  %s2198_s27 = smov 4  }
  0x27   : > { %s2216_s2 = sld [smem:[#allocation25_spill]]  ;;  %s1556_s14 = scalar_lea.vmem %s297_s22, 1024 }
  0x28   : > { %p1557_p13 = scmp.ne.s32.totalorder %s297_s22, %s1556_s14  ;;  %p1564_p3 = scmp.lt.s32.totalorder %s297_s22, %s297_s22 }
  0x29   : > { %p1565_p10 = scmp.lt.s32.totalorder %s1556_s14, %s1556_s14 }
  0x2a   : > { %p1559_p0 = pnand %p1557_p13, %p1521_p12 }
  0x2b   : > { %p1566_p7 = por %p1565_p10, %p1564_p3 }
  0x2c   : > { %p1560_p5 = pneg %p1559_p0 }
  0x2d   : > { %1412 = dma.hbm_to_vmem [thread:$0]  (!%p1873_p11), %s2216_s2, 128, %s281_s19, [#allocation6], %s2196_s26, %s2196_s26, %s2198_s27  }
  0x2e   : > { %p1567_p9 = pnand %p1566_p7, %p1560_p5 }
  0x30   : > { %1570 = shalt.err (!%p1567_p9)
}
  0x31   : > { %s2217_s4 = sld [smem:[#allocation26_spill]]  ;;  %s1582_s19 = scalar_lea.vmem %s313_s24, 1024 }
  0x32   : > { %p1583_p1 = scmp.ne.s32.totalorder %s313_s24, %s1582_s19  ;;  %p1590_p3 = scmp.lt.s32.totalorder %s313_s24, %s313_s24 }
  0x33   : > { %p1591_p5 = scmp.lt.s32.totalorder %s1582_s19, %s1582_s19 }
  0x34   : > { %p1585_p13 = pnand %p1583_p1, %p1521_p12 }
  0x35   : > { %p1592_p10 = por %p1591_p5, %p1590_p3 }
  0x36   : > { %p1586_p0 = pneg %p1585_p13 }
  0x37   : > { %1415 = dma.hbm_to_vmem [thread:$0]  (!%p1873_p11), %s2217_s4, 1024, %s297_s22, [#allocation9], %s2196_s26, %s2196_s26, %s2198_s27  }
  0x38   : > { %p1593_p7 = pnand %p1592_p10, %p1586_p0 }
  0x3a   : > { %1596 = shalt.err (!%p1593_p7)
}
  0x3b   : > { %s2218_s6 = sld [smem:[#allocation27_spill]]  ;;  %s1913_s22 = sadd.s32 1, %s1759_s12  }
  0x3c   : > { %2219 = sst [smem:[#allocation22_spill]] %s1913_s22  ;;  %s37_s20 = ssub.s32 %s1759_s12, %s1913_s22 }
  0x3d   : > { %s40_s28 = sadd.s32 1, %s1755_s11  ;;  %p38_p1 = scmp.eq.s32.totalorder %s37_s20, 0 }
  0x3e   : > { %p47_p12 = scmp.ne.s32.totalorder %s1755_s11, %s1751_s10  ;;  %p48_p9 = scmp.eq.s32.totalorder %s1759_s12, 0 }
  0x3f   : > { %p1436_p13 = scmp.lt.s32.totalorder %s1759_s12, 2  ;;  %s329_s18 = sand.u32 1, %s1755_s11  }
  0x40   : > { %s1923_s29 = scalar_select %p38_p1, %s1755_s11, %s40_s28  }
  0x41   : > { %1418 = dma.hbm_to_vmem [thread:$0]  (!%p1873_p11), %s2218_s6, 1024, %s313_s24, [#allocation9], %s2196_s26, %s2196_s26, %s2198_s27  }
  0x42   : > { %2220 = sst [smem:[#allocation23_spill]] %s1923_s29  ;;  %p49_p0 = por %p48_p9, %p47_p12 }
  0x43   : > { %p1927_p3 = por %p229_p2, %p47_p12  ;;  %s1281_s21 = sshll.u32 %s1759_s12, 8 }
  0x44   : > { %s1933_s24 = sshll.u32 %s329_s18, 4  ;;  %s2222_s0 = sld [smem:[#allocation24_spill]] }
  0x45   : > { %s2221_s14 = scalar_select %p1927_p3, 1, 0 }
  0x46   : > { %s333_s20 = scalar_lea.vmem [#allocation2], %s1933_s24  ;;  %p1941_p11 = pnand %p1436_p13, %p49_p0 }
  0x47   : > { %s341_s28 = sshll.u32 %s333_s20, 4  ;;  %s1950_s19 = scalar_lea.hbm %s2186_s1, %s1281_s21  ;;  %s1945_s28 = int_to_ptr.vmem [resolvable:$true] %s341_s28 }
  0x48   : > { %s1952_s23 = scalar_lea.sflag [#allocation3], %s329_s18  ;;  %p1599_p5 = pneg %p1941_p11 }
  0x4a   : > { %s1938_s25 = scalar_lea.hbm %s2222_s0, %s1281_s21  ;;  %s1602_s29 = scalar_lea.hbm %s2222_s0, 512 }
  0x4b   : > { %s1597_s4 = scalar_lea.hbm %s1938_s25, 256  ;;  %p1603_p1 = scmp.lt.s32.totalorder %s1938_s25, %s2222_s0 }
  0x4c   : > { %p1598_p2 = scmp.ne.s32.totalorder %s1938_s25, %s1597_s4  ;;  %p1604_p12 = scmp.lt.s32.totalorder %s1602_s29, %s1597_s4 }
  0x4e   : > { %p1600_p10 = pnand %p1599_p5, %p1598_p2  ;;  %p1605_p9 = por %p1604_p12, %p1603_p1 }
  0x50   : > { %p1601_p7 = pneg %p1600_p10 }
  0x52   : > { %p1606_p13 = pnand %p1605_p9, %p1601_p7 }
  0x54   : > { %1609 = shalt.err (!%p1606_p13)
}
  0x55   : > { %s1610_s2 = scalar_lea.vmem %s1945_s28, 256  ;;  %s1766_s6 = smov [#allocation2]  }
  0x56   : > { %p1611_p0 = scmp.ne.s32.totalorder %s1945_s28, %s1610_s2  ;;  %s1615_s27 = sshll.u32 %s1766_s6, 4  ;;  %s1616_s27 = int_to_ptr.vmem [resolvable:$false] %s1615_s27 }
  0x57   : > { %s1617_s18 = scalar_lea.vmem %s1616_s27, 512  ;;  %p1618_p6 = scmp.lt.s32.totalorder %s1945_s28, %s1616_s27 }
  0x58   : > { %p1613_p2 = pnand %p1611_p0, %p1599_p5  ;;  %p1619_p3 = scmp.lt.s32.totalorder %s1617_s18, %s1610_s2 }
  0x5a   : > { %p1614_p10 = pneg %p1613_p2  ;;  %p1620_p4 = por %p1619_p3, %p1618_p6 }
  0x5c   : > { %p1621_p1 = pnand %p1620_p4, %p1614_p10 }
  0x5e   : > { %1624 = shalt.err (!%p1621_p1)
}
  0x5f   : > { %s2224_s4 = smov 4   ;;  %s2225_s11 = smov 64  }
  0x60   : > { %1422 = dma.hbm_to_vmem [thread:$0]  (!%p1941_p11), %s1938_s25, 256, %s1945_s28, %s1952_s23, %s2225_s11, %s2225_s11, %s2224_s4  }
  0x61   : > { %s355_s22 = scalar_lea.vmem [#allocation5], %s1933_s24  ;;  %s351_s21 = sand.u32 1, %s1759_s12  }
  0x62   : > { %s363_s29 = sshll.u32 %s355_s22, 4  ;;  %s352_s20 = scalar_lea.sflag [#allocation6], %s351_s21  ;;  %s1984_s29 = int_to_ptr.vmem [resolvable:$true] %s363_s29 }
  0x63   : > { %s1625_s2 = scalar_lea.hbm %s1950_s19, 256  ;;  %s1630_s18 = scalar_lea.hbm %s2186_s1, 512 }
  0x64   : > { %p1626_p4 = scmp.ne.s32.totalorder %s1950_s19, %s1625_s2  ;;  %p1631_p7 = scmp.lt.s32.totalorder %s1950_s19, %s2186_s1 }
  0x65   : > { %p1632_p12 = scmp.lt.s32.totalorder %s1630_s18, %s1625_s2 }
  0x66   : > { %p1628_p6 = pnand %p1626_p4, %p1599_p5 }
  0x67   : > { %p1633_p9 = por %p1632_p12, %p1631_p7 }
  0x68   : > { %p1629_p3 = pneg %p1628_p6 }
  0x6a   : > { %p1634_p13 = pnand %p1633_p9, %p1629_p3 }
  0x6c   : > { %1637 = shalt.err (!%p1634_p13)
}
  0x6d   : > { %s1638_s24 = scalar_lea.vmem %s1984_s29, 256  ;;  %s1767_s25 = smov [#allocation5]  }
  0x6e   : > { %p1639_p0 = scmp.ne.s32.totalorder %s1984_s29, %s1638_s24  ;;  %s1643_s28 = sshll.u32 %s1767_s25, 4  ;;  %s1644_s28 = int_to_ptr.vmem [resolvable:$false] %s1643_s28 }
  0x6f   : > { %s1645_s23 = scalar_lea.vmem %s1644_s28, 512  ;;  %p1646_p1 = scmp.lt.s32.totalorder %s1984_s29, %s1644_s28 }
  0x70   : > { %p1641_p2 = pnand %p1639_p0, %p1599_p5  ;;  %p1647_p4 = scmp.lt.s32.totalorder %s1645_s23, %s1638_s24 }
  0x72   : > { %p1642_p10 = pneg %p1641_p2  ;;  %p1648_p6 = por %p1647_p4, %p1646_p1 }
  0x74   : > { %p1649_p7 = pnand %p1648_p6, %p1642_p10 }
  0x76   : > { %1652 = shalt.err (!%p1649_p7)
}
  0x77   : > { %1425 = dma.hbm_to_vmem [thread:$0]  (!%p1941_p11), %s1950_s19, 256, %s1984_s29, %s352_s20, %s2225_s11, %s2225_s11, %s2224_s4  }
  0x78   : > { %375 = sbr.rel (%p1864_p8) target bundleno = 1493 (0x5d5), region = 52  ;;  %s2014_s0 = sand.u32 (!%p1864_p8), 1, %s1751_s10  }
  0x79   : > { %s1233_s16 = sshll.u32 (!%p1864_p8), %s2014_s0, 4  ;;  %s378_s22 = scalar_lea.sflag (!%p1864_p8), [#allocation3], %s2014_s0 }
  0x7a   : > { %s381_s21 = scalar_lea.vmem (!%p1864_p8), [#allocation2], %s1233_s16  ;;  %p2226_p5 = scmp.ne.s32.totalorder (!%p1864_p8), %s2211_s15, 0 }
  0x7d   : > { %1722 = dma.done.wait (%p2226_p5), %s378_s22, 256  }
  0x7e   : > { %1724 = vsyncadd (%p2226_p5), %s378_s22, 4294967040  ;;  %s386_s26 = sand.u32 1, %s1845_s13   ;;  %s2023_s17 = scalar_lea.vmem [#allocation5], %s1233_s16 }
  0x7f   : > { %s387_s19 = scalar_lea.sflag [#allocation6], %s386_s26 }
  0x80   : > { %1726 = dma.done.wait (%p2226_p5), %s387_s19, 256  }
  0x81   : > { %1728 = vsyncadd (%p2226_p5), %s387_s19, 4294967040  ;;  %p2227_p8 = scmp.eq.s32.totalorder %s1845_s13, 0 }
  0x83   : > { %1730 = dma.done.wait (%p2227_p8), [#allocation6], 128   ;;  %p2228_p11 = pmov %p2227_p8 }
  0x84   : > { %p2229_p3 = pmov %p2227_p8 }
  0x85   : > { %1732 = vsyncadd (%p2228_p11), [#allocation6], 4294967168 }
  0x86   : > { %1734 = dma.done.wait (%p2229_p3), [#allocation9], 2048   ;;  %p2230_p12 = pmov %p2229_p3 }
  0x87   : > { %v1482_v0 = vld [vmem:[#allocation7] sm:$0xff]   ;;  %vm485_vm0 = vcmask 130048   ;;  %v1484_v2 = vld [vmem:[%s381_s21 + $0x8] sm:$0xff]   ;;  %v1768_v3 = vmov 0.0   ;;  %vm1769_vm1 = vmmov 0   ;;  %v1489_v19 = vld [vmem:[#allocation8 + $0x28] sm:$0xff]  }
  0x88   : > { %1736 = vsyncadd (%p2230_p12), [#allocation9], 4294965248  ;;  %v1483_v1 = vld [vmem:[%s381_s21] sm:$0xff]   ;;  %1319 = vmatprep.subr.bf16.mxu1 %v1482_v0  ;;  %1331 = vmatprep.subr.bf16.mxu0 %v1768_v3  ;;  %v2049_v14 = vld [vmem:[%s2023_s17 + $0x8] sm:$0xff]   ;;  %s1238_s20 = sshll.u32 %s2014_s0, 5  ;;  %s1285_s24 = sshll.u32 %s1845_s13, 9 }
  0x89   : > { %1320 = vmatpush3.bf16.msra.mxu1 %v1482_v0  ;;  %1321 = vmatprep.mubr.msk.bf16.mxu1 %vm485_vm0, %v1483_v1  ;;  %v1240_v5 = vld [vmem:[%s2188_s3] ss:$0 sm:$0xff]  ;;  %v1488_v18 = vld [vmem:[#allocation8 + $0x30] sm:$0xff]   ;;  %v1490_v20 = vld [vmem:[#allocation8 + $0x20] sm:$0xff]   ;;  %s2070_s2 = scalar_lea.vmem [#allocation12], %s1238_s20  ;;  %s2100_s23 = scalar_lea.hbm %s2194_s9, %s1285_s24 }
  0x8a   : > { %1325 = vmatprep.subr.bf16.mxu1 %v1768_v3  ;;  %1333 = vmatprep.mubr.msk.bf16.mxu0 %vm1769_vm1, %v1768_v3  ;;  %v1487_v15 = vld [vmem:[#allocation8 + $0x38] sm:$0xff]   ;;  %v1492_v22 = vld [vmem:[#allocation8 + $0x10] sm:$0xff]   ;;  %v1493_v23 = vld [vmem:[#allocation8 + $0x8] sm:$0xff]   ;;  %s1062_s18 = sshll.u32 %s2070_s2, 4  ;;  %s1031_s16 = scalar_lea.sflag [#allocation13], %s2014_s0  ;;  %s2093_s18 = int_to_ptr.vmem [resolvable:$true] %s1062_s18 }
  0x8b   : > { %v1486_v17 = vld [vmem:[%s2023_s17] sm:$0xff]   ;;  %v1494_v24 = vld [vmem:[#allocation8] sm:$0xff]   ;;  %v1496_v51 = vld [vmem:[#allocation10 + $0x30] sm:$0xff]   ;;  %s1653_s22 = scalar_lea.vmem %s2093_s18, 512  ;;  %p2231_p13 = scmp.ne.s32.totalorder %s2221_s14, 0 }
  0x8c   : > { %1322 = vmatmul.mubr.msk.bf16.vlgmr.msra.gmra.mxu1 %vm485_vm0, %v1484_v2  ;;  %v1491_v21 = vld [vmem:[#allocation8 + $0x18] sm:$0xff]   ;;  %v1497_v52 = vld [vmem:[#allocation10 + $0x28] sm:$0xff]   ;;  %v1498_v53 = vld [vmem:[#allocation10 + $0x20] sm:$0xff]   ;;  %p1654_p9 = scmp.ne.s32.totalorder %s2093_s18, %s1653_s22  ;;  %s1770_s21 = smov [#allocation12]  }
  0x8d   : > { %1327 = vmatprep.mubr.msk.bf16.mxu1 %vm1769_vm1, %v1768_v3  ;;  %v1250_v42 = vld [vmem:[%s2190_s5] ss:$0 sm:$0xff]  ;;  %v1500_v55 = vld [vmem:[#allocation10 + $0x10] sm:$0xff]   ;;  %v1501_v56 = vld [vmem:[#allocation10 + $0x8] sm:$0xff]   ;;  %s1657_s26 = sshll.u32 %s1770_s21, 4  ;;  %s1658_s26 = int_to_ptr.vmem [resolvable:$false] %s1657_s26 }
  0x8e   : > { %v1495_v49 = vld [vmem:[#allocation10 + $0x38] sm:$0xff]   ;;  %v1502_v57 = vld [vmem:[#allocation10] sm:$0xff]   ;;  %p1655_p0 = pnand %p1654_p9, %p2231_p13  ;;  %s1659_s19 = scalar_lea.vmem %s1658_s26, 1024 }
  0x8f   : > { %v1499_v54 = vld [vmem:[#allocation10 + $0x18] sm:$0xff]   ;;  %p1660_p10 = scmp.lt.s32.totalorder %s2093_s18, %s1658_s26  ;;  %p1661_p1 = scmp.lt.s32.totalorder %s1659_s19, %s1653_s22 }
  0x90   : > { %p1656_p2 = pneg %p1655_p0 }
  0x91   : > { %p1662_p4 = por %p1661_p1, %p1660_p10 }
  0x93   : > { %p1663_p6 = pnand %p1662_p4, %p1656_p2 }
 0x14c   : > { %v1323_v4 = vpop.f32.mrf.mxu1 }
 0x14d   : > { %v535_v8 = vadd.f32 %v1323_v4, %v1240_v5 }
 0x14e   : > { %v526_v6 = vpop.f32.mrf.mxu1 }
 0x14f   : > { %v527_v11 = vadd.f32 %v1240_v5, %v526_v6 }
 0x150   : > { %v1324_v7 = vpop.f32.mrf.mxu1 }
 0x151   : > { %v538_v9 = vadd.f32 %v1324_v7, %v1240_v5 }
 0x152   : > { %v529_v10 = vpop.f32.mrf.mxu1 }
 0x153   : > { %v530_v12 = vadd.f32 %v1240_v5, %v529_v10  ;;  %v542_v13 = vpack.c.bf16 %v538_v9, %v535_v8  ;;  %v1261_v8 = vld [vmem:[%s2192_s7] ss:$0 sm:$0xff] }
 0x155   : > { %v541_v16 = vpack.c.bf16 %v530_v12, %v527_v11  ;;  %1332 = vmatpush3.bf16.msra.mxu0 %v542_v13 }
 0x156   : > { %1357 = vmatprep.subr.bf16.mxu0 %v1768_v3 }
 0x157   : > { %1326 = vmatpush3.bf16.msra.mxu1 %v541_v16 }
 0x158   : > { %1334 = vmatmul.mubr.msk.bf16.vlgmr.msra.gmra.mxu0 %vm485_vm0, %v2049_v14  ;;  %1337 = vmatprep.subr.bf16.mxu1 %v1487_v15 }
 0x159   : > { %1359 = vmatprep.mubr.msk.bf16.mxu0 %vm1769_vm1, %v1768_v3 }
 0x15a   : > { %1328 = vmatmul.mubr.msk.bf16.vlgmr.msra.gmra.mxu1 %vm485_vm0, %v1486_v17 }
 0x15b   : > { %1338 = vmatpush3.bf16.msra.mxu1 %v1487_v15 }
 0x15c   : > { %1339 = vmatprep.subr.bf16.mxu1 %v1488_v18 }
 0x15f   : > { %1340 = vmatpush3.bf16.msra.mxu1 %v1488_v18 }
 0x160   : > { %1341 = vmatprep.subr.bf16.mxu1 %v1489_v19 }
 0x163   : > { %1342 = vmatpush3.bf16.msra.mxu1 %v1489_v19 }
 0x164   : > { %1343 = vmatprep.subr.bf16.mxu1 %v1490_v20 }
 0x167   : > { %1344 = vmatpush3.bf16.msra.mxu1 %v1490_v20 }
 0x168   : > { %1345 = vmatprep.subr.bf16.mxu1 %v1491_v21 }
 0x16b   : > { %1346 = vmatpush3.bf16.msra.mxu1 %v1491_v21 }
 0x16c   : > { %1347 = vmatprep.subr.bf16.mxu1 %v1492_v22 }
 0x16f   : > { %1348 = vmatpush3.bf16.msra.mxu1 %v1492_v22 }
 0x170   : > { %1349 = vmatprep.subr.bf16.mxu1 %v1493_v23 }
 0x173   : > { %1350 = vmatpush3.bf16.msra.mxu1 %v1493_v23 }
 0x174   : > { %1351 = vmatprep.subr.bf16.mxu1 %v1494_v24 }
 0x177   : > { %1352 = vmatpush3.bf16.msra.mxu1 %v1494_v24 }
 0x218   : > { %v634_v25 = vpop.f32.mrf.mxu0 }
 0x219   : > { %v643_v30 = vmax.f32 %v634_v25, 0.0 }
 0x21a   : > { %v585_v26 = vpop.f32.mrf.mxu1  ;;  %v1335_v27 = vpop.f32.mrf.mxu0 }
 0x21b   : > { %v641_v34 = vmax.f32 %v585_v26, 0.0 }
 0x21c   : > { %v1329_v28 = vpop.f32.mrf.mxu1  ;;  %v637_v29 = vpop.f32.mrf.mxu0 }
 0x21d   : > { %v644_v31 = vmax.f32 %v637_v29, 0.0 }
 0x21e   : > { %v588_v32 = vpop.f32.mrf.mxu1  ;;  %v1336_v33 = vpop.f32.mrf.mxu0 }
 0x21f   : > { %v642_v35 = vmax.f32 %v588_v32, 0.0  ;;  %v646_v38 = vpack.c.bf16 %v644_v31, %v643_v30 }
 0x220   : > { %v1330_v36 = vpop.f32.mrf.mxu1 }
 0x221   : > { %v645_v37 = vpack.c.bf16 %v642_v35, %v641_v34 }
 0x223   : > { %1353 = vmatprep.mubr.bf16.mxu1 %v645_v37 }
 0x224   : > { %1354 = vmatmul.mubr.bf16.vlgmr.msra.gmra.mxu1 %v646_v38 }
 0x2e4   : > { %v1355_v39 = vpop.f32.mrf.mxu1 }
 0x2e5   : > { %v761_v48 = vadd.f32 %v1355_v39, %v1250_v42 }
 0x2e6   : > { %v752_v40 = vpop.f32.mrf.mxu1 }
 0x2e7   : > { %v753_v44 = vadd.f32 %v1250_v42, %v752_v40 }
 0x2e8   : > { %v1356_v41 = vpop.f32.mrf.mxu1 }
 0x2e9   : > { %v764_v46 = vadd.f32 %v1356_v41, %v1250_v42 }
 0x2ea   : > { %v755_v43 = vpop.f32.mrf.mxu1 }
 0x2eb   : > { %v756_v45 = vadd.f32 %v1250_v42, %v755_v43  ;;  %v768_v50 = vpack.c.bf16 %v764_v46, %v761_v48 }
 0x2ed   : > { %v767_v47 = vpack.c.bf16 %v756_v45, %v753_v44 }
 0x2ef   : > { %1358 = vmatpush3.bf16.msra.mxu0 %v767_v47 }
 0x2f0   : > { %1363 = vmatprep.subr.bf16.mxu0 %v1768_v3 }
 0x2f2   : > { %1360 = vmatmul.mubr.msk.bf16.vlgmr.msra.gmra.mxu0 %vm485_vm0, %v1486_v17 }
 0x2f3   : > { %1364 = vmatpush3.bf16.msra.mxu0 %v768_v50  ;;  %1365 = vmatprep.mubr.msk.bf16.mxu0 %vm1769_vm1, %v1768_v3 }
 0x2f4   : > { %1369 = vmatprep.subr.bf16.mxu0 %v1495_v49 }
 0x2fa   : > { %1366 = vmatmul.mubr.msk.bf16.vlgmr.msra.gmra.mxu0 %vm485_vm0, %v2049_v14 }
 0x2fb   : > { %1370 = vmatpush3.bf16.msra.mxu0 %v1495_v49 }
 0x2fc   : > { %1371 = vmatprep.subr.bf16.mxu0 %v1496_v51 }
 0x2ff   : > { %1372 = vmatpush3.bf16.msra.mxu0 %v1496_v51 }
 0x300   : > { %1373 = vmatprep.subr.bf16.mxu0 %v1497_v52 }
 0x303   : > { %1374 = vmatpush3.bf16.msra.mxu0 %v1497_v52 }
 0x304   : > { %1375 = vmatprep.subr.bf16.mxu0 %v1498_v53 }
 0x307   : > { %1376 = vmatpush3.bf16.msra.mxu0 %v1498_v53 }
 0x308   : > { %1377 = vmatprep.subr.bf16.mxu0 %v1499_v54 }
 0x30b   : > { %1378 = vmatpush3.bf16.msra.mxu0 %v1499_v54 }
 0x30c   : > { %1379 = vmatprep.subr.bf16.mxu0 %v1500_v55 }
 0x30f   : > { %1380 = vmatpush3.bf16.msra.mxu0 %v1500_v55 }
 0x310   : > { %1381 = vmatprep.subr.bf16.mxu0 %v1501_v56 }
 0x313   : > { %1382 = vmatpush3.bf16.msra.mxu0 %v1501_v56 }
 0x314   : > { %1383 = vmatprep.subr.bf16.mxu0 %v1502_v57 }
 0x317   : > { %1384 = vmatpush3.bf16.msra.mxu0 %v1502_v57 }
 0x3b2   : > { %v803_v58 = vpop.f32.mrf.mxu0 }
 0x3b3   : > { %v851_v59 = vmax.f32 %v803_v58, 0.0 }
 0x3b4   : > { %v1361_v60 = vpop.f32.mrf.mxu0 }
 0x3b5   : > { %855 = vst [vmem:[%s2070_s2] sm:$0xff] %v851_v59 }
 0x3b6   : > { %v806_v61 = vpop.f32.mrf.mxu0 }
 0x3b7   : > { %v852_v62 = vmax.f32 %v806_v61, 0.0 }
 0x3b8   : > { %v1362_v63 = vpop.f32.mrf.mxu0 }
 0x3b9   : > { %856 = vst [vmem:[%s2070_s2 + $0x8] sm:$0xff] %v852_v62  ;;  %v859_v0 = vpack.c.bf16 %v852_v62, %v851_v59 }
 0x3ba   : > { %v844_v1 = vpop.f32.mrf.mxu0 }
 0x3bb   : > { %v853_v2 = vmax.f32 %v844_v1, 0.0  ;;  %1385 = vmatprep.mubr.bf16.mxu0 %v859_v0 }
 0x3bc   : > { %v1367_v3 = vpop.f32.mrf.mxu0 }
 0x3bd   : > { %857 = vst [vmem:[%s2070_s2 + $0x10] sm:$0xff] %v853_v2 }
 0x3be   : > { %v847_v4 = vpop.f32.mrf.mxu0 }
 0x3bf   : > { %v854_v5 = vmax.f32 %v847_v4, 0.0 }
 0x3c0   : > { %v1368_v6 = vpop.f32.mrf.mxu0 }
 0x3c1   : > { %858 = vst [vmem:[%s2070_s2 + $0x18] sm:$0xff] %v854_v5  ;;  %v860_v7 = vpack.c.bf16 %v854_v5, %v853_v2 }
 0x3c3   : > { %1386 = vmatmul.mubr.bf16.vlgmr.msra.gmra.mxu0 %v860_v7 }
 0x483   : > { %v1387_v9 = vpop.f32.mrf.mxu0 }
 0x484   : > { %v975_v10 = vadd.f32 %v1387_v9, %v1261_v8 }
 0x485   : > { %v966_v11 = vpop.f32.mrf.mxu0 }
 0x486   : > { %v967_v12 = vadd.f32 %v1261_v8, %v966_v11  ;;  %985 = vmax.xlane.f32.xlu1 %v975_v10 }
 0x487   : > { %v1388_v13 = vpop.f32.mrf.mxu0 }
 0x488   : > { %v978_v14 = vadd.f32 %v1388_v13, %v1261_v8  ;;  %981 = vmax.xlane.f32.xlu0 %v967_v12 }
 0x489   : > { %v969_v15 = vpop.f32.mrf.mxu0 }
 0x48a   : > { %v970_v16 = vadd.f32 %v1261_v8, %v969_v15  ;;  %987 = vmax.xlane.f32.xlu1 %v978_v14 }
 0x48c   : > { %983 = vmax.xlane.f32.xlu0 %v970_v16 }
 0x50f   : > { %v986_v17 = vpop.xlane.xlu1 %985 }
 0x510   : > { %v2079_v18 = vsub.f32 %v975_v10, %v986_v17 }
 0x511   : > { %v982_v19 = vpop.xlane.xlu0 %981 }
 0x512   : > { %v2081_v20 = vsub.f32 %v967_v12, %v982_v19  ;;  %v997_v23 = vmul.f32 1.442695, %v2079_v18 }
 0x513   : > { %v988_v21 = vpop.xlane.xlu1 %987 }
 0x514   : > { %v993_v22 = vmul.f32 1.442695, %v2081_v20  ;;  %v2085_v25 = vsub.f32 %v978_v14, %v988_v21 }
 0x515   : > { %v984_v24 = vpop.xlane.xlu0 %983 }
 0x516   : > { %1503 = vpow2.f32 %v993_v22  ;;  %v2087_v26 = vsub.f32 %v970_v16, %v984_v24  ;;  %v999_v28 = vmul.f32 1.442695, %v2085_v25 }
 0x517   : > { %1505 = vpow2.f32 %v997_v23 }
 0x518   : > { %v995_v27 = vmul.f32 1.442695, %v2087_v26 }
 0x51a   : > { %1507 = vpow2.f32 %v995_v27 }
 0x51b   : > { %1509 = vpow2.f32 %v999_v28 }
 0x523   : > { %v1504_v29 = vpop.eup %1503 }
 0x524   : > { %1001 = vadd.xlane.f32.xlu0 %v1504_v29  ;;  %v1506_v30 = vpop.eup %1505 }
 0x527   : > { %v1508_v31 = vpop.eup %1507 }
 0x528   : > { %1005 = vadd.xlane.f32.xlu0 %v1506_v30  ;;  %1003 = vadd.xlane.f32.xlu1 %v1508_v31  ;;  %v1510_v32 = vpop.eup %1509 }
 0x52c   : > { %1007 = vadd.xlane.f32.xlu1 %v1510_v32 }
 0x52d   : > { %1666 = shalt.err (!%p1663_p6)
}
 0x52e   : > { %s1667_s17 = scalar_lea.hbm %s2100_s23, 512  ;;  %s1671_s11 = scalar_lea.hbm %s2194_s9, 1024 }
 0x52f   : > { %p1668_p7 = scmp.ne.s32.totalorder %s2100_s23, %s1667_s17  ;;  %p1672_p11 = scmp.lt.s32.totalorder %s2100_s23, %s2194_s9 }
 0x530   : > { %p1673_p3 = scmp.lt.s32.totalorder %s1671_s11, %s1667_s17 }
 0x531   : > { %p1669_p5 = pnand %p1668_p7, %p2231_p13 }
 0x532   : > { %p1674_p12 = por %p1673_p3, %p1672_p11 }
 0x533   : > { %p1670_p8 = pneg %p1669_p5 }
 0x535   : > { %p1675_p9 = pnand %p1674_p12, %p1670_p8 }
 0x537   : > { %1678 = shalt.err (!%p1675_p9)
}
 0x538   : > { %s1771_s6 = smov 128   ;;  %s1772_s27 = smov 8  }
 0x539   : > { %1406 = dma.vmem_to_hbm [thread:$0]  (%p2231_p13), %s2093_s18, 512, %s2100_s23, %s1031_s16, %s1771_s6, %s1771_s6, %s1772_s27  }
 0x53a   : > { %s439_s25 = scalar_lea.vmem [#allocation11], %s1238_s20  ;;  %s2141_s23 = scalar_lea.hbm %s2193_s8, %s1285_s24 }
 0x53b   : > { %s1045_s18 = sshll.u32 %s439_s25, 4  ;;  %s1026_s16 = scalar_lea.sflag [#allocation4], %s2014_s0  ;;  %s2133_s18 = int_to_ptr.vmem [resolvable:$true] %s1045_s18 }
 0x53c   : > { %s1679_s22 = scalar_lea.vmem %s2133_s18, 512  ;;  %s1773_s21 = smov [#allocation11]  }
 0x53d   : > { %p1680_p0 = scmp.ne.s32.totalorder %s2133_s18, %s1679_s22  ;;  %s1683_s26 = sshll.u32 %s1773_s21, 4  ;;  %s1684_s26 = int_to_ptr.vmem [resolvable:$false] %s1683_s26 }
 0x53e   : > { %s1685_s19 = scalar_lea.vmem %s1684_s26, 1024  ;;  %p1686_p1 = scmp.lt.s32.totalorder %s2133_s18, %s1684_s26 }
 0x53f   : > { %p1681_p2 = pnand %p1680_p0, %p2231_p13  ;;  %p1687_p4 = scmp.lt.s32.totalorder %s1685_s19, %s1679_s22 }
 0x541   : > { %p1682_p10 = pneg %p1681_p2  ;;  %p1688_p6 = por %p1687_p4, %p1686_p1 }
 0x543   : > { %p1689_p7 = pnand %p1688_p6, %p1682_p10 }
 0x5ad   : > { %v1002_v33 = vpop.xlane.xlu0 %1001 }
 0x5ae   : > { %1511 = vlog2.f32 %v1002_v33 }
 0x5b1   : > { %v1004_v34 = vpop.xlane.xlu1 %1003  ;;  %v1006_v35 = vpop.xlane.xlu0 %1005 }
 0x5b2   : > { %1513 = vlog2.f32 %v1004_v34 }
 0x5b3   : > { %1515 = vlog2.f32 %v1006_v35 }
 0x5b5   : > { %v1008_v36 = vpop.xlane.xlu1 %1007 }
 0x5b6   : > { %1517 = vlog2.f32 %v1008_v36 }
 0x5bb   : > { %v1512_v37 = vpop.eup %1511 }
 0x5bc   : > { %v1010_v38 = vmul.f32 0.6931472, %v1512_v37 }
 0x5be   : > { %v1017_v39 = vsub.f32 %v2081_v20, %v1010_v38 }
 0x5bf   : > { %v1514_v40 = vpop.eup %1513 }
 0x5c0   : > { %v1516_v41 = vpop.eup %1515  ;;  %1021 = vst [vmem:[%s439_s25] sm:$0xff] %v1017_v39  ;;  %v1012_v42 = vmul.f32 0.6931472, %v1514_v40 }
 0x5c1   : > { %v1014_v43 = vmul.f32 0.6931472, %v1516_v41 }
 0x5c2   : > { %v1018_v44 = vsub.f32 %v2087_v26, %v1012_v42 }
 0x5c3   : > { %v1518_v45 = vpop.eup %1517  ;;  %v1019_v46 = vsub.f32 %v2079_v18, %v1014_v43 }
 0x5c4   : > { %1022 = vst [vmem:[%s439_s25 + $0x8] sm:$0xff] %v1018_v44  ;;  %v1016_v47 = vmul.f32 0.6931472, %v1518_v45 }
 0x5c5   : > { %1023 = vst [vmem:[%s439_s25 + $0x10] sm:$0xff] %v1019_v46 }
 0x5c6   : > { %v1020_v48 = vsub.f32 %v2085_v25, %v1016_v47 }
 0x5c8   : > { %1024 = vst [vmem:[%s439_s25 + $0x18] sm:$0xff] %v1020_v48 }
 0x5c9   : > { %1692 = shalt.err (!%p1689_p7)
}
 0x5ca   : > { %s1693_s13 = scalar_lea.hbm %s2141_s23, 512  ;;  %s1697_s17 = scalar_lea.hbm %s2193_s8, 1024 }
 0x5cb   : > { %p1694_p5 = scmp.ne.s32.totalorder %s2141_s23, %s1693_s13  ;;  %p1698_p3 = scmp.lt.s32.totalorder %s2141_s23, %s2193_s8 }
 0x5cc   : > { %p1699_p12 = scmp.lt.s32.totalorder %s1697_s17, %s1693_s13 }
 0x5cd   : > { %p1695_p8 = pnand %p1694_p5, %p2231_p13 }
 0x5ce   : > { %p1700_p9 = por %p1699_p12, %p1698_p3 }
 0x5cf   : > { %p1696_p11 = pneg %p1695_p8 }
 0x5d1   : > { %p1701_p0 = pnand %p1700_p9, %p1696_p11 }
 0x5d3   : > { %1704 = shalt.err (!%p1701_p0)
}
 0x5d4   : > { %1405 = dma.vmem_to_hbm [thread:$0]  (%p2231_p13), %s2133_s18, 512, %s2141_s23, %s1026_s16, %s1771_s6, %s1771_s6, %s1772_s27  }
 0x5d5 PF: > { %s2232_s11 = sld [smem:[#allocation21_spill]]  ;;  %s1077_s29 = sand.u32 1, %s1747_s30  }
 0x5d6   : > { %p2234_p10 = scmp.ge.s32.totalorder %s1759_s12, 2  ;;  %s1078_s2 = scalar_lea.sflag [#allocation4], %s1077_s29 }
 0x5db   : > { %p2233_p2 = scmp.ne.s32.totalorder %s2232_s11, 0 }
 0x5dd   : > { %p1427_p1 = pnand %p2234_p10, %p2233_p2 }
 0x5df   : > { %p1428_p4 = pneg %p1427_p1 }
 0x5e1   : > { %1738 = dma.done.wait (%p1428_p4), %s1078_s2, 512  }
 0x5e2   : > { %1740 = vsyncadd (%p1428_p4), %s1078_s2, 4294966784  ;;  %s1087_s25 = scalar_lea.sflag [#allocation13], %s1077_s29 }
 0x5e3   : > { %1742 = dma.done.wait (%p1428_p4), %s1087_s25, 512  }
 0x5e4   : > { %1744 = vsyncadd (%p1428_p4), %s1087_s25, 4294966784  ;;  %s2235_s12 = sld [smem:[#allocation22_spill]]  ;;  %s2238_s30 = smov %s1751_s10 }
 0x5e5   : > { %s2236_s14 = sld [smem:[#allocation20_spill]] }
 0x5e6   : > { %s2237_s11 = sld [smem:[#allocation23_spill]] }
 0x5ea   : > { %p30_p13 = scmp.ge.s32.totalorder %s2235_s12, 4  }
 0x5eb   : > { %s2239_s10 = smov %s2236_s14 }
 0x5ec   :  { %32 = sbr.rel (!%p30_p13) target bundleno = 15 (0xf), region = 139 }
 0x5f1   :  { %1092 = vsyncpa [#allocation3], 1 }
 0x5f2   :  { %1094 = vsyncpa [#allocation3 + $0x1], 1 }
 0x5f3   :  { %1095 = vsyncpa [#allocation6], 1 }
 0x5f4   :  { %1097 = vsyncpa [#allocation6 + $0x1], 1 }
 0x5f5   :  { %1098 = vsyncpa [#allocation9], 1 }
 0x5f6   :  { %1099 = vsyncpa [#allocation4], 1 }
 0x5f7   :  { %1101 = vsyncpa [#allocation4 + $0x1], 1 }
 0x5f8   :  { %1102 = vsyncpa [#allocation13], 1 }
 0x5f9   :  { %1104 = vsyncpa [#allocation13 + $0x1], 1 }

</bundles_post_ra>
